<compile_context>
chip_gen: v5e
topology: v5e:2x2
jax: 0.10.0
libtpu: 0.0.40
codegen_flags: <defaults>
</compile_context>

<pallas_src>
import jax
import jax.numpy as jnp
from jax.experimental import pallas as pl
from jax.experimental.pallas import tpu as pltpu

EPS = 1e-5


def _round_up(n, m):
    return ((n + m - 1) // m) * m


def _make_generator_kernel(b_real, b_pad):
    """Build the fused kernel; batch sizes are baked in as Python constants."""
    need_mask = b_pad != b_real
    inv_b = 1.0 / float(b_real)

    def kernel(x_ref,
               w1_ref, b1_ref, g1_ref, be1_ref,
               w2_ref, b2_ref, g2_ref, be2_ref,
               w3_ref, b3_ref, g3_ref, be3_ref,
               w4_ref, b4_ref,
               out_ref):

        def linear(h, w_ref, b_ref):
            # bf16 MXU operands, f32 accumulation; bias add stays in f32.
            return jnp.dot(h.astype(jnp.bfloat16), w_ref[...],
                           preferred_element_type=jnp.float32) + b_ref[...]

        def leaky_relu(h, slope):
            return jnp.where(h > 0, h, slope * h)

        if need_mask:
            row_ok = jax.lax.broadcasted_iota(jnp.int32, (b_pad, 1), 0) < b_real

        def batchnorm(h, g_ref, be_ref):
            # Training-mode BatchNorm1d, single-pass statistics:
            #   var = E[h^2] - mu^2   (f32 throughout)
            hm = jnp.where(row_ok, h, 0.0) if need_mask else h
            s1 = jnp.sum(hm, axis=0, keepdims=True)
            s2 = jnp.sum(hm * hm, axis=0, keepdims=True)
            mu = s1 * inv_b
            var = s2 * inv_b - mu * mu
            scale = g_ref[...] * jax.lax.rsqrt(var + EPS)
            shift = be_ref[...] - mu * scale
            return h * scale + shift

        h = x_ref[...].astype(jnp.float32)

        h = batchnorm(leaky_relu(linear(h, w1_ref, b1_ref), 0.01), g1_ref, be1_ref)
        h = batchnorm(leaky_relu(linear(h, w2_ref, b2_ref), 0.01), g2_ref, be2_ref)
        h = batchnorm(leaky_relu(linear(h, w3_ref, b3_ref), 0.01), g3_ref, be3_ref)

        h = linear(h, w4_ref, b4_ref)
        # LeakyReLU(0) == ReLU
        out_ref[...] = jnp.maximum(h, 0.0).astype(out_ref.dtype)

    return kernel


def generator_forward(x, params):
    """x: [B, latent_dim] float32.  params: (w1,b1,g1,be1, ..., w4,b4) in f32."""
    (w1, b1, g1, be1, w2, b2, g2, be2, w3, b3, g3, be3, w4, b4) = params
    B, latent = x.shape
    out_dim = w4.shape[1]

    b_pad = max(_round_up(B, 8), 8)          # sublane multiple
    lat_pad = _round_up(latent, 128)         # lane-dense K for the first matmul
    out_pad = _round_up(out_dim, 128)        # lane-dense output store

    # Zero-pad input / edge weights; pad rows/cols contribute exactly zero.
    xp = jnp.pad(x.astype(jnp.float32),
                 ((0, b_pad - B), (0, lat_pad - latent)))
    w1p = jnp.pad(w1.astype(jnp.bfloat16), ((0, lat_pad - latent), (0, 0)))
    w4p = jnp.pad(w4.astype(jnp.bfloat16), ((0, 0), (0, out_pad - out_dim)))
    b4p = jnp.pad(b4.astype(jnp.float32), ((0, 0), (0, out_pad - out_dim)))

    padded_params = (
        w1p, b1, g1, be1,
        w2.astype(jnp.bfloat16), b2, g2, be2,
        w3.astype(jnp.bfloat16), b3, g3, be3,
        w4p, b4p,
    )

    vmem_spec = pl.BlockSpec(memory_space=pltpu.MemorySpace.VMEM)
    n_inputs = 1 + len(padded_params)

    # Advisory cost estimate.
    flops = 2 * b_pad * (lat_pad * 128 + 128 * 256 + 256 * 512 + 512 * out_pad)
    param_bytes = sum(int(p.size) * p.dtype.itemsize for p in padded_params)
    bytes_accessed = int(xp.size) * 4 + param_bytes + b_pad * out_pad * 4
    transcendentals = 128 + 256 + 512  # one rsqrt per BN feature

    # Explicit VMEM budget: inputs + params + output + live activations,
    # with generous headroom, capped below v7x physical VMEM (64 MiB).
    act_bytes = b_pad * (128 + 256 + 512 + out_pad) * 4
    need = bytes_accessed + act_bytes
    vmem_limit = int(min(64 * 1024 * 1024, max(6 * need, 16 * 1024 * 1024)))

    out_padded = pl.pallas_call(
        _make_generator_kernel(B, b_pad),
        out_shape=jax.ShapeDtypeStruct((b_pad, out_pad), jnp.float32),
        in_specs=[vmem_spec] * n_inputs,
        out_specs=vmem_spec,
        compiler_params=pltpu.CompilerParams(vmem_limit_bytes=vmem_limit),
        cost_estimate=pl.CostEstimate(flops=flops,
                                      transcendentals=transcendentals,
                                      bytes_accessed=bytes_accessed),
    )(xp, *padded_params)

    return out_padded[:B, :out_dim]


def init_params(key, latent_dim, output_dim):
    """Deterministic parameter init mirroring the PyTorch module shapes (f32)."""
    dims = [latent_dim, 128, 256, 512, output_dim]
    keys = jax.random.split(key, 8)
    params = []
    ki = 0
    for layer in range(4):
        fan_in, fan_out = dims[layer], dims[layer + 1]
        bound = 1.0 / float(fan_in) ** 0.5
        w = jax.random.uniform(keys[ki], (fan_in, fan_out), jnp.float32, -bound, bound)
        ki += 1
        b = jax.random.uniform(keys[ki], (1, fan_out), jnp.float32, -bound, bound)
        ki += 1
        params.append(w)
        params.append(b)
        if layer < 3:  # BatchNorm affine params (gamma=1, beta=0 at init)
            params.append(jnp.ones((1, fan_out), jnp.float32))
            params.append(jnp.zeros((1, fan_out), jnp.float32))
    return tuple(params)


def reference_forward(x, params):
    """Pure-JAX reference with the same bf16-at-MXU / f32-accumulate numerics."""
    (w1, b1, g1, be1, w2, b2, g2, be2, w3, b3, g3, be3, w4, b4) = params

    def mm(h, w):
        return jnp.dot(h.astype(jnp.bfloat16), w.astype(jnp.bfloat16),
                       preferred_element_type=jnp.float32)

    def lrelu(h, s):
        return jnp.where(h > 0, h, s * h)

    def bn(h, g, be):
        mu = jnp.mean(h, axis=0, keepdims=True)
        var = jnp.mean((h - mu) ** 2, axis=0, keepdims=True)
        return (h - mu) / jnp.sqrt(var + EPS) * g + be

    h = bn(lrelu(mm(x, w1) + b1, 0.01), g1, be1)
    h = bn(lrelu(mm(h, w2) + b2, 0.01), g2, be2)
    h = bn(lrelu(mm(h, w3) + b3, 0.01), g3, be3)
    return jnp.maximum(mm(h, w4) + b4, 0.0)


if __name__ == "__main__":
    latent_dim = 32
    output_dim = 64
    batch = 8

    key = jax.random.PRNGKey(0)
    k_x, k_p = jax.random.split(key)
    x = jax.random.normal(k_x, (batch, latent_dim), jnp.float32)
    params = init_params(k_p, latent_dim, output_dim)

    fwd = jax.jit(generator_forward)
    out = fwd(x, params)
    out = jax.block_until_ready(out)

    ref = reference_forward(x, params)
    assert out.shape == (batch, output_dim)
    assert jnp.allclose(out, ref, atol=2e-2, rtol=2e-2), "mismatch vs reference"

    print("KERNEL_OK")
</pallas_src>

<mosaic_0001>
module attributes {stable_mosaic.version = 11 : i64} {
  func.func @kernel(%arg0: memref<8x128xf32, #tpu.memory_space<vmem>>, %arg1: memref<128x128xbf16, #tpu.memory_space<vmem>>, %arg2: memref<1x128xf32, #tpu.memory_space<vmem>>, %arg3: memref<1x128xf32, #tpu.memory_space<vmem>>, %arg4: memref<1x128xf32, #tpu.memory_space<vmem>>, %arg5: memref<128x256xbf16, #tpu.memory_space<vmem>>, %arg6: memref<1x256xf32, #tpu.memory_space<vmem>>, %arg7: memref<1x256xf32, #tpu.memory_space<vmem>>, %arg8: memref<1x256xf32, #tpu.memory_space<vmem>>, %arg9: memref<256x512xbf16, #tpu.memory_space<vmem>>, %arg10: memref<1x512xf32, #tpu.memory_space<vmem>>, %arg11: memref<1x512xf32, #tpu.memory_space<vmem>>, %arg12: memref<1x512xf32, #tpu.memory_space<vmem>>, %arg13: memref<512x128xbf16, #tpu.memory_space<vmem>>, %arg14: memref<1x128xf32, #tpu.memory_space<vmem>>, %arg15: memref<8x128xf32, #tpu.memory_space<vmem>>) attributes {dimension_semantics = [], scalar_prefetch = 0 : i64, scratch_operands = 0 : i64, tpu.core_type = #tpu.core_type<tc>} {
    %c0 = arith.constant 0 : index
    %c0_0 = arith.constant 0 : index
    %0 = vector.load %arg0[%c0, %c0_0] : memref<8x128xf32, #tpu.memory_space<vmem>>, vector<8x128xf32>
    %1 = arith.truncf %0 : vector<8x128xf32> to vector<8x128xbf16>
    %c0_1 = arith.constant 0 : index
    %c0_2 = arith.constant 0 : index
    %2 = vector.load %arg1[%c0_1, %c0_2] : memref<128x128xbf16, #tpu.memory_space<vmem>>, vector<128x128xbf16>
    %cst = arith.constant dense<0.000000e+00> : vector<8x128xf32>
    %3 = tpu.matmul %1, %2, %cst {dimension_numbers = #tpu.dot_dimension_numbers<[1], [0], [0], [1], [0, 0, 1, 1], [], []>} : vector<8x128xbf16>, vector<128x128xbf16>, vector<8x128xf32> -> vector<8x128xf32>
    %c0_3 = arith.constant 0 : index
    %c0_4 = arith.constant 0 : index
    %4 = vector.load %arg2[%c0_3, %c0_4] : memref<1x128xf32, #tpu.memory_space<vmem>>, vector<1x128xf32>
    %5 = vector.broadcast %4 : vector<1x128xf32> to vector<8x128xf32>
    %6 = arith.addf %3, %5 : vector<8x128xf32>
    %cst_5 = arith.constant 0.000000e+00 : f32
    %7 = vector.broadcast %cst_5 : f32 to vector<8x128xf32>
    %8 = arith.cmpf ogt, %6, %7 : vector<8x128xf32>
    %cst_6 = arith.constant 0.00999999977 : f32
    %9 = vector.broadcast %cst_6 : f32 to vector<8x128xf32>
    %10 = arith.mulf %9, %6 : vector<8x128xf32>
    %11 = arith.select %8, %6, %10 : vector<8x128xi1>, vector<8x128xf32>
    %cst_7 = arith.constant dense<0.000000e+00> : vector<128xf32>
    %12 = vector.multi_reduction <add>, %11, %cst_7 [0] : vector<8x128xf32> to vector<128xf32>
    %13 = vector.shape_cast %12 : vector<128xf32> to vector<1x128xf32>
    %14 = arith.mulf %11, %11 : vector<8x128xf32>
    %cst_8 = arith.constant dense<0.000000e+00> : vector<128xf32>
    %15 = vector.multi_reduction <add>, %14, %cst_8 [0] : vector<8x128xf32> to vector<128xf32>
    %16 = vector.shape_cast %15 : vector<128xf32> to vector<1x128xf32>
    %cst_9 = arith.constant 1.250000e-01 : f32
    %17 = vector.broadcast %cst_9 : f32 to vector<1x128xf32>
    %18 = arith.mulf %13, %17 : vector<1x128xf32>
    %cst_10 = arith.constant 1.250000e-01 : f32
    %19 = vector.broadcast %cst_10 : f32 to vector<1x128xf32>
    %20 = arith.mulf %16, %19 : vector<1x128xf32>
    %21 = arith.mulf %18, %18 : vector<1x128xf32>
    %22 = arith.subf %20, %21 : vector<1x128xf32>
    %c0_11 = arith.constant 0 : index
    %c0_12 = arith.constant 0 : index
    %23 = vector.load %arg3[%c0_11, %c0_12] : memref<1x128xf32, #tpu.memory_space<vmem>>, vector<1x128xf32>
    %cst_13 = arith.constant 9.99999974E-6 : f32
    %24 = vector.broadcast %cst_13 : f32 to vector<1x128xf32>
    %25 = arith.addf %22, %24 : vector<1x128xf32>
    %26 = math.rsqrt %25 : vector<1x128xf32>
    %27 = arith.mulf %23, %26 : vector<1x128xf32>
    %c0_14 = arith.constant 0 : index
    %c0_15 = arith.constant 0 : index
    %28 = vector.load %arg4[%c0_14, %c0_15] : memref<1x128xf32, #tpu.memory_space<vmem>>, vector<1x128xf32>
    %29 = arith.mulf %18, %27 : vector<1x128xf32>
    %30 = arith.subf %28, %29 : vector<1x128xf32>
    %31 = vector.broadcast %27 : vector<1x128xf32> to vector<8x128xf32>
    %32 = arith.mulf %11, %31 : vector<8x128xf32>
    %33 = vector.broadcast %30 : vector<1x128xf32> to vector<8x128xf32>
    %34 = arith.addf %32, %33 : vector<8x128xf32>
    %35 = arith.truncf %34 : vector<8x128xf32> to vector<8x128xbf16>
    %c0_16 = arith.constant 0 : index
    %c0_17 = arith.constant 0 : index
    %36 = vector.load %arg5[%c0_16, %c0_17] : memref<128x256xbf16, #tpu.memory_space<vmem>>, vector<128x256xbf16>
    %cst_18 = arith.constant dense<0.000000e+00> : vector<8x256xf32>
    %37 = tpu.matmul %35, %36, %cst_18 {dimension_numbers = #tpu.dot_dimension_numbers<[1], [0], [0], [1], [0, 0, 1, 1], [], []>} : vector<8x128xbf16>, vector<128x256xbf16>, vector<8x256xf32> -> vector<8x256xf32>
    %c0_19 = arith.constant 0 : index
    %c0_20 = arith.constant 0 : index
    %38 = vector.load %arg6[%c0_19, %c0_20] : memref<1x256xf32, #tpu.memory_space<vmem>>, vector<1x256xf32>
    %39 = vector.broadcast %38 : vector<1x256xf32> to vector<8x256xf32>
    %40 = arith.addf %37, %39 : vector<8x256xf32>
    %cst_21 = arith.constant 0.000000e+00 : f32
    %41 = vector.broadcast %cst_21 : f32 to vector<8x256xf32>
    %42 = arith.cmpf ogt, %40, %41 : vector<8x256xf32>
    %cst_22 = arith.constant 0.00999999977 : f32
    %43 = vector.broadcast %cst_22 : f32 to vector<8x256xf32>
    %44 = arith.mulf %43, %40 : vector<8x256xf32>
    %45 = arith.select %42, %40, %44 : vector<8x256xi1>, vector<8x256xf32>
    %cst_23 = arith.constant dense<0.000000e+00> : vector<256xf32>
    %46 = vector.multi_reduction <add>, %45, %cst_23 [0] : vector<8x256xf32> to vector<256xf32>
    %47 = vector.shape_cast %46 : vector<256xf32> to vector<1x256xf32>
    %48 = arith.mulf %45, %45 : vector<8x256xf32>
    %cst_24 = arith.constant dense<0.000000e+00> : vector<256xf32>
    %49 = vector.multi_reduction <add>, %48, %cst_24 [0] : vector<8x256xf32> to vector<256xf32>
    %50 = vector.shape_cast %49 : vector<256xf32> to vector<1x256xf32>
    %cst_25 = arith.constant 1.250000e-01 : f32
    %51 = vector.broadcast %cst_25 : f32 to vector<1x256xf32>
    %52 = arith.mulf %47, %51 : vector<1x256xf32>
    %cst_26 = arith.constant 1.250000e-01 : f32
    %53 = vector.broadcast %cst_26 : f32 to vector<1x256xf32>
    %54 = arith.mulf %50, %53 : vector<1x256xf32>
    %55 = arith.mulf %52, %52 : vector<1x256xf32>
    %56 = arith.subf %54, %55 : vector<1x256xf32>
    %c0_27 = arith.constant 0 : index
    %c0_28 = arith.constant 0 : index
    %57 = vector.load %arg7[%c0_27, %c0_28] : memref<1x256xf32, #tpu.memory_space<vmem>>, vector<1x256xf32>
    %cst_29 = arith.constant 9.99999974E-6 : f32
    %58 = vector.broadcast %cst_29 : f32 to vector<1x256xf32>
    %59 = arith.addf %56, %58 : vector<1x256xf32>
    %60 = math.rsqrt %59 : vector<1x256xf32>
    %61 = arith.mulf %57, %60 : vector<1x256xf32>
    %c0_30 = arith.constant 0 : index
    %c0_31 = arith.constant 0 : index
    %62 = vector.load %arg8[%c0_30, %c0_31] : memref<1x256xf32, #tpu.memory_space<vmem>>, vector<1x256xf32>
    %63 = arith.mulf %52, %61 : vector<1x256xf32>
    %64 = arith.subf %62, %63 : vector<1x256xf32>
    %65 = vector.broadcast %61 : vector<1x256xf32> to vector<8x256xf32>
    %66 = arith.mulf %45, %65 : vector<8x256xf32>
    %67 = vector.broadcast %64 : vector<1x256xf32> to vector<8x256xf32>
    %68 = arith.addf %66, %67 : vector<8x256xf32>
    %69 = arith.truncf %68 : vector<8x256xf32> to vector<8x256xbf16>
    %c0_32 = arith.constant 0 : index
    %c0_33 = arith.constant 0 : index
    %70 = vector.load %arg9[%c0_32, %c0_33] : memref<256x512xbf16, #tpu.memory_space<vmem>>, vector<256x512xbf16>
    %cst_34 = arith.constant dense<0.000000e+00> : vector<8x512xf32>
    %71 = tpu.matmul %69, %70, %cst_34 {dimension_numbers = #tpu.dot_dimension_numbers<[1], [0], [0], [1], [0, 0, 1, 1], [], []>} : vector<8x256xbf16>, vector<256x512xbf16>, vector<8x512xf32> -> vector<8x512xf32>
    %c0_35 = arith.constant 0 : index
    %c0_36 = arith.constant 0 : index
    %72 = vector.load %arg10[%c0_35, %c0_36] : memref<1x512xf32, #tpu.memory_space<vmem>>, vector<1x512xf32>
    %73 = vector.broadcast %72 : vector<1x512xf32> to vector<8x512xf32>
    %74 = arith.addf %71, %73 : vector<8x512xf32>
    %cst_37 = arith.constant 0.000000e+00 : f32
    %75 = vector.broadcast %cst_37 : f32 to vector<8x512xf32>
    %76 = arith.cmpf ogt, %74, %75 : vector<8x512xf32>
    %cst_38 = arith.constant 0.00999999977 : f32
    %77 = vector.broadcast %cst_38 : f32 to vector<8x512xf32>
    %78 = arith.mulf %77, %74 : vector<8x512xf32>
    %79 = arith.select %76, %74, %78 : vector<8x512xi1>, vector<8x512xf32>
    %cst_39 = arith.constant dense<0.000000e+00> : vector<512xf32>
    %80 = vector.multi_reduction <add>, %79, %cst_39 [0] : vector<8x512xf32> to vector<512xf32>
    %81 = vector.shape_cast %80 : vector<512xf32> to vector<1x512xf32>
    %82 = arith.mulf %79, %79 : vector<8x512xf32>
    %cst_40 = arith.constant dense<0.000000e+00> : vector<512xf32>
    %83 = vector.multi_reduction <add>, %82, %cst_40 [0] : vector<8x512xf32> to vector<512xf32>
    %84 = vector.shape_cast %83 : vector<512xf32> to vector<1x512xf32>
    %cst_41 = arith.constant 1.250000e-01 : f32
    %85 = vector.broadcast %cst_41 : f32 to vector<1x512xf32>
    %86 = arith.mulf %81, %85 : vector<1x512xf32>
    %cst_42 = arith.constant 1.250000e-01 : f32
    %87 = vector.broadcast %cst_42 : f32 to vector<1x512xf32>
    %88 = arith.mulf %84, %87 : vector<1x512xf32>
    %89 = arith.mulf %86, %86 : vector<1x512xf32>
    %90 = arith.subf %88, %89 : vector<1x512xf32>
    %c0_43 = arith.constant 0 : index
    %c0_44 = arith.constant 0 : index
    %91 = vector.load %arg11[%c0_43, %c0_44] : memref<1x512xf32, #tpu.memory_space<vmem>>, vector<1x512xf32>
    %cst_45 = arith.constant 9.99999974E-6 : f32
    %92 = vector.broadcast %cst_45 : f32 to vector<1x512xf32>
    %93 = arith.addf %90, %92 : vector<1x512xf32>
    %94 = math.rsqrt %93 : vector<1x512xf32>
    %95 = arith.mulf %91, %94 : vector<1x512xf32>
    %c0_46 = arith.constant 0 : index
    %c0_47 = arith.constant 0 : index
    %96 = vector.load %arg12[%c0_46, %c0_47] : memref<1x512xf32, #tpu.memory_space<vmem>>, vector<1x512xf32>
    %97 = arith.mulf %86, %95 : vector<1x512xf32>
    %98 = arith.subf %96, %97 : vector<1x512xf32>
    %99 = vector.broadcast %95 : vector<1x512xf32> to vector<8x512xf32>
    %100 = arith.mulf %79, %99 : vector<8x512xf32>
    %101 = vector.broadcast %98 : vector<1x512xf32> to vector<8x512xf32>
    %102 = arith.addf %100, %101 : vector<8x512xf32>
    %103 = arith.truncf %102 : vector<8x512xf32> to vector<8x512xbf16>
    %c0_48 = arith.constant 0 : index
    %c0_49 = arith.constant 0 : index
    %104 = vector.load %arg13[%c0_48, %c0_49] : memref<512x128xbf16, #tpu.memory_space<vmem>>, vector<512x128xbf16>
    %cst_50 = arith.constant dense<0.000000e+00> : vector<8x128xf32>
    %105 = tpu.matmul %103, %104, %cst_50 {dimension_numbers = #tpu.dot_dimension_numbers<[1], [0], [0], [1], [0, 0, 1, 1], [], []>} : vector<8x512xbf16>, vector<512x128xbf16>, vector<8x128xf32> -> vector<8x128xf32>
    %c0_51 = arith.constant 0 : index
    %c0_52 = arith.constant 0 : index
    %106 = vector.load %arg14[%c0_51, %c0_52] : memref<1x128xf32, #tpu.memory_space<vmem>>, vector<1x128xf32>
    %107 = vector.broadcast %106 : vector<1x128xf32> to vector<8x128xf32>
    %108 = arith.addf %105, %107 : vector<8x128xf32>
    %cst_53 = arith.constant 0.000000e+00 : f32
    %109 = vector.broadcast %cst_53 : f32 to vector<8x128xf32>
    %110 = arith.maximumf %108, %109 : vector<8x128xf32>
    %c0_54 = arith.constant 0 : index
    %c0_55 = arith.constant 0 : index
    %111 = vector.load %arg15[%c0_54, %c0_55] : memref<8x128xf32, #tpu.memory_space<vmem>>, vector<8x128xf32>
    tpu.vector_store %arg15[%c0_54, %c0_55], %110 {strides = array<i32>} : memref<8x128xf32, #tpu.memory_space<vmem>>, vector<8x128xf32>,
    return
  }
}

</mosaic_0001>

<bundles_post_ra>
// kernel: generator_forward.1
= control target key start
LH: loop header
LB: loop body
LE: loop exit
PB: predicated region body
PF: predicated region fallthrough
CT: control target
= control target key end

     0   :  { %s2914_s0 = inlined_call_operand.vmem [shape: f32[8,128], index: 0, kind: input, shape index: {}]   ;;  %s2915_s1 = inlined_call_operand.vmem [shape: bf16[128,128], index: 1, kind: input, shape index: {}]   ;;  %s2916_s2 = inlined_call_operand.vmem [shape: f32[1,128], index: 2, kind: input, shape index: {}]   ;;  %s2917_s3 = inlined_call_operand.vmem [shape: f32[1,128], index: 3, kind: input, shape index: {}]   ;;  %s2918_s4 = inlined_call_operand.vmem [shape: f32[1,128], index: 4, kind: input, shape index: {}]   ;;  %s2919_s5 = inlined_call_operand.vmem [shape: bf16[128,256], index: 5, kind: input, shape index: {}]   ;;  %s2920_s6 = inlined_call_operand.vmem [shape: f32[1,256], index: 6, kind: input, shape index: {}]   ;;  %s2921_s7 = inlined_call_operand.vmem [shape: f32[1,256], index: 7, kind: input, shape index: {}]   ;;  %s2922_s8 = inlined_call_operand.vmem [shape: f32[1,256], index: 8, kind: input, shape index: {}]   ;;  %s2923_s9 = inlined_call_operand.vmem [shape: bf16[256,512], index: 9, kind: input, shape index: {}]   ;;  %s2924_s10 = inlined_call_operand.vmem [shape: f32[1,512], index: 10, kind: input, shape index: {}]   ;;  %s2925_s11 = inlined_call_operand.vmem [shape: f32[1,512], index: 11, kind: input, shape index: {}]   ;;  %s2926_s12 = inlined_call_operand.vmem [shape: f32[1,512], index: 12, kind: input, shape index: {}]   ;;  %s2927_s13 = inlined_call_operand.vmem [shape: bf16[512,128], index: 13, kind: input, shape index: {}]   ;;  %s2928_s14 = inlined_call_operand.vmem [shape: f32[1,128], index: 14, kind: input, shape index: {}]   ;;  %s2929_s15 = inlined_call_operand.hbm [shape: f32[8,128], index: 15, kind: output, shape index: {}]  }
   0x1   :  { %v1903_v0 = vld [vmem:[%s2915_s1 + $0x38] sm:$0xff]  ;;  %v1902_v1 = vld [vmem:[%s2915_s1 + $0x30] sm:$0xff] }
   0x2   :  { %121 = vmatpush.bf16.msra.mxu0 %v1903_v0 }
   0x3   :  { %20 = vsyncpa [#allocation3], 0  ;;  %v1901_v2 = vld [vmem:[%s2915_s1 + $0x28] sm:$0xff]  ;;  %v1900_v3 = vld [vmem:[%s2915_s1 + $0x20] sm:$0xff]  ;;  %vm373_vm10 = vcmask 1040384   ;;  %s1407_s30 = sshll.u32 %s2929_s15, 4  ;;  %s1408_s30 = int_to_ptr.hbm [resolvable:$true] %s1407_s30 }
   0x4   :  { %v1899_v4 = vld [vmem:[%s2915_s1 + $0x18] sm:$0xff]  ;;  %v1898_v5 = vld [vmem:[%s2915_s1 + $0x10] sm:$0xff]  ;;  %v1897_v6 = vld [vmem:[%s2915_s1 + $0x8] sm:$0xff] }
   0x5   :  { %v1896_v7 = vld [vmem:[%s2915_s1] sm:$0xff]  ;;  %v1506_v10 = vld [vmem:[%s2919_s5 + $0x70] sm:$0xf]  ;;  %v1919_v11 = vld [vmem:[%s2919_s5 + $0x74] sm:$0xf0] }
   0x6   :  { %122 = vmatpush.bf16.msra.mxu0 %v1902_v1  ;;  %v51_v8 = vld [vmem:[%s2914_s0] sm:$0xff]  ;;  %v1918_v12 = vld [vmem:[%s2919_s5 + $0x74] sm:$0xf]  ;;  %v1507_v13 = vor.u32 %v1919_v11, %v1506_v10  ;;  %v1508_v14 = vld [vmem:[%s2919_s5 + $0x78] sm:$0xf0]  ;;  %s2059_s0 = smov [#allocation2]  }
   0x7   :  { %v52_v9 = vpack.c.bf16 %v51_v8, %v51_v8  ;;  %v1498_v15 = vld [vmem:[%s2919_s5 + $0x60] sm:$0xf]  ;;  %v1917_v16 = vld [vmem:[%s2919_s5 + $0x64] sm:$0xf0]  ;;  %v1511_v17 = vor.u32 %v1918_v12, %v1508_v14  ;;  %v1916_v18 = vld [vmem:[%s2919_s5 + $0x64] sm:$0xf] }
   0x8   :  { %v1500_v19 = vld [vmem:[%s2919_s5 + $0x68] sm:$0xf0]  ;;  %281 = vmatpush.bf16.msra.mxu1 %v1507_v13  ;;  %v1499_v20 = vor.u32 %v1917_v16, %v1498_v15  ;;  %v1490_v22 = vld [vmem:[%s2919_s5 + $0x50] sm:$0xf]  ;;  %v1915_v23 = vld [vmem:[%s2919_s5 + $0x54] sm:$0xf0] }
   0x9   :  { %294 = vmatpush.bf16.msra.mxu2 %v1511_v17  ;;  %v1503_v21 = vor.u32 %v1916_v18, %v1500_v19  ;;  %v1914_v24 = vld [vmem:[%s2919_s5 + $0x54] sm:$0xf]  ;;  %v1492_v25 = vld [vmem:[%s2919_s5 + $0x58] sm:$0xf0]  ;;  %v1491_v26 = vor.u32 %v1915_v23, %v1490_v22  ;;  %v1482_v28 = vld [vmem:[%s2919_s5 + $0x40] sm:$0xf] }
   0xa   :  { %123 = vmatpush.bf16.msra.mxu0 %v1901_v2  ;;  %v1495_v27 = vor.u32 %v1914_v24, %v1492_v25  ;;  %v1913_v29 = vld [vmem:[%s2919_s5 + $0x44] sm:$0xf0]  ;;  %v1912_v30 = vld [vmem:[%s2919_s5 + $0x44] sm:$0xf]  ;;  %v1484_v31 = vld [vmem:[%s2919_s5 + $0x48] sm:$0xf0] }
   0xb   :  { %v1483_v32 = vor.u32 %v1913_v29, %v1482_v28  ;;  %v1487_v33 = vor.u32 %v1912_v30, %v1484_v31  ;;  %v1474_v34 = vld [vmem:[%s2919_s5 + $0x30] sm:$0xf]  ;;  %v1911_v35 = vld [vmem:[%s2919_s5 + $0x34] sm:$0xf0]  ;;  %v2017_v36 = vld [vmem:[%s2916_s2] ss:$0 sm:$0xff] }
   0xc   :  { %282 = vmatpush.bf16.msra.mxu1 %v1499_v20  ;;  %v1910_v37 = vld [vmem:[%s2919_s5 + $0x34] sm:$0xf]  ;;  %v1476_v38 = vld [vmem:[%s2919_s5 + $0x38] sm:$0xf0]  ;;  %v1475_v39 = vor.u32 %v1911_v35, %v1474_v34  ;;  %v1466_v42 = vld [vmem:[%s2919_s5 + $0x20] sm:$0xf] }
   0xd   :  { %295 = vmatpush.bf16.msra.mxu2 %v1503_v21  ;;  %v1479_v41 = vor.u32 %v1910_v37, %v1476_v38  ;;  %v1909_v43 = vld [vmem:[%s2919_s5 + $0x24] sm:$0xf0]  ;;  %v1908_v45 = vld [vmem:[%s2919_s5 + $0x24] sm:$0xf]  ;;  %v1468_v46 = vld [vmem:[%s2919_s5 + $0x28] sm:$0xf0] }
   0xe   :  { %124 = vmatpush.bf16.msra.mxu0 %v1900_v3  ;;  %v1467_v48 = vor.u32 %v1909_v43, %v1466_v42  ;;  %v1471_v49 = vor.u32 %v1908_v45, %v1468_v46  ;;  %v1458_v50 = vld [vmem:[%s2919_s5 + $0x10] sm:$0xf]  ;;  %v1907_v51 = vld [vmem:[%s2919_s5 + $0x14] sm:$0xf0]  ;;  %v1906_v53 = vld [vmem:[%s2919_s5 + $0x14] sm:$0xf] }
   0xf   :  { %v1460_v54 = vld [vmem:[%s2919_s5 + $0x18] sm:$0xf0]  ;;  %v1459_v57 = vor.u32 %v1907_v51, %v1458_v50  ;;  %v1450_v62 = vld [vmem:[%s2919_s5] sm:$0xf]  ;;  %v1905_v63 = vld [vmem:[%s2919_s5 + $0x4] sm:$0xf0] }
  0x10   :  { %283 = vmatpush.bf16.msra.mxu1 %v1491_v26  ;;  %v1463_v61 = vor.u32 %v1906_v53, %v1460_v54  ;;  %v1904_v0 = vld [vmem:[%s2919_s5 + $0x4] sm:$0xf]  ;;  %v1452_v1 = vld [vmem:[%s2919_s5 + $0x8] sm:$0xf0]  ;;  %v154_v23 = vld [vmem:[%s2917_s3] sm:$0x1] }
  0x11   :  { %296 = vmatpush.bf16.msra.mxu2 %v1495_v27  ;;  %v167_v27 = vld [vmem:[%s2918_s4] sm:$0x1]  ;;  %v1756_v45 = vld [vmem:[%s2923_s9 + $0x1f0] sm:$0xf0]  ;;  %v1944_v53 = vld [vmem:[%s2923_s9 + $0xc4] sm:$0xf] }
  0x12   :  { %125 = vmatpush.bf16.msra.mxu0 %v1899_v4  ;;  %v1451_v4 = vor.u32 %v1905_v63, %v1450_v62  ;;  %v1626_v35 = vld [vmem:[%s2923_s9 + $0xe0] sm:$0xf]  ;;  %v1612_v54 = vld [vmem:[%s2923_s9 + $0xd0] sm:$0xf0]  ;;  %v1942_v62 = vld [vmem:[%s2923_s9 + $0xac] sm:$0xf0] }
  0x13   :  { %v1754_v37 = vld [vmem:[%s2923_s9 + $0x1e0] sm:$0xf]  ;;  %s1405_s28 = sshll.u32 %s2059_s0, 4  ;;  %s1406_s28 = int_to_ptr.vmem [resolvable:$true] %s1405_s28 }
  0x14   :  { %284 = vmatpush.bf16.msra.mxu1 %v1483_v32  ;;  %v195_v46 = vld [vmem:[%s2920_s6] sm:$0x3] }
  0x15   :  { %297 = vmatpush.bf16.msra.mxu2 %v1487_v33  ;;  %v1738_v50 = vld [vmem:[%s2923_s9 + $0x1c0] sm:$0xf] }
  0x16   :  { %126 = vmatpush.bf16.msra.mxu0 %v1898_v5  ;;  %v1722_v63 = vld [vmem:[%s2923_s9 + $0x1a0] sm:$0xf] }
  0x18   :  { %285 = vmatpush.bf16.msra.mxu1 %v1475_v39  ;;  %v1982_v39 = vld [vmem:[%s2923_s9 + $0x1ec] sm:$0xf0] }
  0x19   :  { %298 = vmatpush.bf16.msra.mxu2 %v1479_v41  ;;  %v1628_v41 = vld [vmem:[%s2923_s9 + $0xf0] sm:$0xf0]  ;;  %v1755_v42 = vor.u32 %v1982_v39, %v1754_v37  ;;  %v1966_v37 = vld [vmem:[%s2923_s9 + $0x16c] sm:$0xf0] }
  0x1a   :  { %127 = vmatpush.bf16.msra.mxu0 %v1897_v6  ;;  %v1455_v6 = vor.u32 %v1904_v0, %v1452_v1 }
  0x1c   :  { %286 = vmatpush.bf16.msra.mxu1 %v1467_v48  ;;  %v1610_v48 = vld [vmem:[%s2923_s9 + $0xc0] sm:$0xf] }
  0x1d   :  { %299 = vmatpush.bf16.msra.mxu2 %v1471_v49  ;;  %v1946_v49 = vld [vmem:[%s2923_s9 + $0xcc] sm:$0xf0] }
  0x1e   :  { %128 = vmatpush.bf16.msra.mxu0 %v1896_v7  ;;  %v1611_v51 = vor.u32 %v1946_v49, %v1610_v48  ;;  %v1546_v49 = vld [vmem:[%s2923_s9 + $0x40] sm:$0xf] }
  0x20   :  { %287 = vmatpush.bf16.msra.mxu1 %v1459_v57  ;;  %v1615_v57 = vor.u32 %v1944_v53, %v1612_v54 }
  0x21   :  { %129 = vmatmul.bf16.vlgmr.msra.gmra.mxu0 %v52_v9  ;;  %300 = vmatpush.bf16.msra.mxu2 %v1463_v61  ;;  %v1594_v61 = vld [vmem:[%s2923_s9 + $0xa0] sm:$0xf] }
  0x22   :  { %809 = vmatpush.bf16.msrb.mxu0 %v1755_v42  ;;  %v1595_v1 = vor.u32 %v1942_v62, %v1594_v61  ;;  %v1960_v61 = vld [vmem:[%s2923_s9 + $0x144] sm:$0xf]  ;;  %v1676_v62 = vld [vmem:[%s2923_s9 + $0x150] sm:$0xf0] }
  0x24   :  { %288 = vmatpush.bf16.msra.mxu1 %v1451_v4  ;;  %v1596_v4 = vld [vmem:[%s2923_s9 + $0xb0] sm:$0xf0] }
  0x25   :  { %301 = vmatpush.bf16.msra.mxu2 %v1455_v6 }
  0x9e   :  { %v130_v40 = vpop.f32.mrf.mxu0 }
  0x9f   :  { %v131_v44 = vadd.f32 %v2017_v36, %v130_v40  ;;  %v1950_v36 = vld [vmem:[%s2923_s9 + $0xec] sm:$0xf0]  ;;  %v1948_v40 = vld [vmem:[%s2923_s9 + $0xe4] sm:$0xf] }
  0xa0   :  { %v1627_v38 = vor.u32 %v1950_v36, %v1626_v35  ;;  %v1631_v43 = vor.u32 %v1948_v40, %v1628_v41  ;;  %v1564_v41 = vld [vmem:[%s2923_s9 + $0x70] sm:$0xf0] }
  0xa1   :  { %vm134_vm0 = vcmp.gt.f32.partialorder %v131_v44, 0.0  ;;  %v135_v47 = vmul.f32 0.01, %v131_v44 }
  0xa2   :  { %796 = vmatpush.bf16.msra.mxu3 %v1627_v38  ;;  %822 = vmatpush.bf16.msrb.mxu1 %v1631_v43  ;;  %v1932_v38 = vld [vmem:[%s2923_s9 + $0x64] sm:$0xf] }
  0xa3   :  { %v136_v52 = vsel %vm134_vm0, %v131_v44, %v135_v47  ;;  %v1980_v44 = vld [vmem:[%s2923_s9 + $0x1e4] sm:$0xf] }
  0xa4   :  { %v137_v55 = vrot.slane %v136_v52, 4  ;;  %v143_v56 = vmul.f32 %v136_v52, %v136_v52  ;;  %v1759_v47 = vor.u32 %v1980_v44, %v1756_v45  ;;  %v1567_v44 = vor.u32 %v1932_v38, %v1564_v41  ;;  %v1964_v45 = vld [vmem:[%s2923_s9 + $0x164] sm:$0xf]  ;;  %v1516_v38 = vld [vmem:[%s2923_s9 + $0x10] sm:$0xf0] }
  0xa6   :  { %v138_v58 = vadd.f32 %v137_v55, %v136_v52  ;;  %v144_v59 = vrot.slane %v143_v56, 4  ;;  %v132_v60 = vpop.f32.mrf.mxu0  ;;  %835 = vmatpush.bf16.msrb.mxu2 %v1759_v47  ;;  %v197_v55 = vperm.slane %v195_v46, 0  ;;  %797 = vmatpush.bf16.msra.mxu3 %v1611_v51  ;;  %v1674_v51 = vld [vmem:[%s2923_s9 + $0x140] sm:$0xf] }
  0xa7   :  { %823 = vmatpush.bf16.msrb.mxu1 %v1615_v57  ;;  %v1928_v57 = vld [vmem:[%s2923_s9 + $0x44] sm:$0xf] }
  0xa8   :  { %v139_v2 = vrot.slane %v138_v58, 2  ;;  %v145_v3 = vadd.f32 %v144_v59, %v143_v56  ;;  %v1740_v59 = vld [vmem:[%s2923_s9 + $0x1d0] sm:$0xf0] }
  0xaa   :  { %v146_v5 = vrot.slane %v145_v3, 2  ;;  %v140_v7 = vadd.f32 %v139_v2, %v138_v58  ;;  %v1976_v58 = vld [vmem:[%s2923_s9 + $0x1c4] sm:$0xf]  ;;  %v1974_v2 = vld [vmem:[%s2923_s9 + $0x1ac] sm:$0xf0]  ;;  %798 = vmatpush.bf16.msra.mxu3 %v1595_v1 }
  0xab   :  { %v1743_v60 = vor.u32 %v1976_v58, %v1740_v59  ;;  %v1723_v6 = vor.u32 %v1974_v2, %v1722_v63 }
  0xac   :  { %v147_v8 = vadd.f32 %v146_v5, %v145_v3  ;;  %v141_v9 = vrot.slane %v140_v7, 1  ;;  %v1940_v3 = vld [vmem:[%s2923_s9 + $0xa4] sm:$0xf] }
  0xad   :  { %836 = vmatpush.bf16.msrb.mxu2 %v1743_v60  ;;  %v1548_v60 = vld [vmem:[%s2923_s9 + $0x50] sm:$0xf0] }
  0xae   :  { %v148_v10 = vrot.slane %v147_v8, 1  ;;  %v142_v11 = vadd.f32 %v141_v9, %v140_v7  ;;  %v1599_v7 = vor.u32 %v1940_v3, %v1596_v4  ;;  %v1724_v9 = vld [vmem:[%s2923_s9 + $0x1b0] sm:$0xf0]  ;;  %v1551_v4 = vor.u32 %v1928_v57, %v1548_v60  ;;  %v1636_v57 = vld [vmem:[%s2923_s9 + $0xf8] sm:$0xf0] }
  0xb0   :  { %v149_v12 = vadd.f32 %v148_v10, %v147_v8  ;;  %v150_v13 = vmul.f32 0.125, %v142_v11  ;;  %v1972_v8 = vld [vmem:[%s2923_s9 + $0x1a4] sm:$0xf]  ;;  %824 = vmatpush.bf16.msrb.mxu1 %v1599_v7  ;;  %v1926_v7 = vld [vmem:[%s2923_s9 + $0x2c] sm:$0xf0] }
  0xb1   :  { %v1727_v10 = vor.u32 %v1972_v8, %v1724_v9  ;;  %v1658_v8 = vld [vmem:[%s2923_s9 + $0x120] sm:$0xf] }
  0xb2   :  { %v151_v14 = vmul.f32 0.125, %v149_v12  ;;  %v152_v15 = vmul.f32 %v150_v13, %v150_v13  ;;  %v198_v12 = vperm.slane %v195_v46, 1  ;;  %v1692_v46 = vld [vmem:[%s2923_s9 + $0x170] sm:$0xf0] }
  0xb3   :  { %837 = vmatpush.bf16.msrb.mxu2 %v1727_v10  ;;  %v1695_v48 = vor.u32 %v1964_v45, %v1692_v46  ;;  %v1634_v45 = vld [vmem:[%s2923_s9 + $0xe8] sm:$0xf] }
  0xb4   :  { %v153_v16 = vsub.f32 %v151_v14, %v152_v15  ;;  %v1938_v14 = vld [vmem:[%s2923_s9 + $0x8c] sm:$0xf0]  ;;  %v1706_v15 = vld [vmem:[%s2923_s9 + $0x180] sm:$0xf] }
  0xb6   :  { %v155_v17 = vadd.f32 1e-05, %v153_v16  ;;  %v1970_v16 = vld [vmem:[%s2923_s9 + $0x18c] sm:$0xf0] }
  0xb8   :  { %2019 = vrsqrt.f32 %v155_v17  ;;  %vm162_vm2 = vweird.f32 %v155_v17 }
  0xbe   :  { %v2020_v18 = vpop.eup %2019 }
  0xbf   :  { %v157_v19 = vmul.f32 %v2020_v18, %v155_v17  ;;  %vm163_vm1 = vweird.f32 %v2020_v18 }
  0xc0   :  { %vm164_vm3 = vmor %vm162_vm2, %vm163_vm1 }
  0xc1   :  { %v158_v20 = vmul.f32 %v2020_v18, %v157_v19  ;;  %v1707_v19 = vor.u32 %v1970_v16, %v1706_v15 }
  0xc3   :  { %v159_v21 = vmul.f32 0.5, %v158_v20  ;;  %v1936_v20 = vld [vmem:[%s2923_s9 + $0x84] sm:$0xf] }
  0xc5   :  { %v160_v22 = vsub.f32 1.5, %v159_v21  ;;  %v1580_v21 = vld [vmem:[%s2923_s9 + $0x90] sm:$0xf0] }
  0xc7   :  { %v161_v24 = vmul.f32 %v2020_v18, %v160_v22  ;;  %v1968_v22 = vld [vmem:[%s2923_s9 + $0x184] sm:$0xf] }
  0xc9   :  { %v165_v25 = vsel %vm164_vm3, %v2020_v18, %v161_v24 }
  0xca   :  { %v166_v26 = vmul.f32 %v165_v25, %v154_v23 }
  0xcc   :  { %v168_v28 = vmul.f32 %v166_v26, %v150_v13  ;;  %v171_v29 = vperm.slane %v166_v26, 0  ;;  %v1578_v13 = vld [vmem:[%s2923_s9 + $0x80] sm:$0xf]  ;;  %v1583_v26 = vor.u32 %v1936_v20, %v1580_v21  ;;  %v1660_v20 = vld [vmem:[%s2923_s9 + $0x130] sm:$0xf0] }
  0xcd   :  { %v1579_v18 = vor.u32 %v1938_v14, %v1578_v13  ;;  %v1958_v13 = vld [vmem:[%s2923_s9 + $0x12c] sm:$0xf0]  ;;  %v1924_v14 = vld [vmem:[%s2923_s9 + $0x24] sm:$0xf] }
  0xce   :  { %v169_v30 = vsub.f32 %v167_v27, %v168_v28  ;;  %v173_v31 = vmul.f32 %v171_v29, %v136_v52  ;;  %v1978_v52 = vld [vmem:[%s2923_s9 + $0x1cc] sm:$0xf0]  ;;  %v1708_v27 = vld [vmem:[%s2923_s9 + $0x190] sm:$0xf0]  ;;  %825 = vmatpush.bf16.msrb.mxu1 %v1583_v26  ;;  %v1659_v16 = vor.u32 %v1958_v13, %v1658_v8  ;;  %v1620_v8 = vld [vmem:[%s2923_s9 + $0xd8] sm:$0xf0] }
  0xcf   :  { %v1739_v56 = vor.u32 %v1978_v52, %v1738_v50  ;;  %799 = vmatpush.bf16.msra.mxu3 %v1579_v18  ;;  %v1711_v29 = vor.u32 %v1968_v22, %v1708_v27  ;;  %v1930_v50 = vld [vmem:[%s2923_s9 + $0x4c] sm:$0xf0]  ;;  %v1532_v18 = vld [vmem:[%s2923_s9 + $0x30] sm:$0xf0]  ;;  %v1514_v27 = vld [vmem:[%s2923_s9] sm:$0xf] }
  0xd0   :  { %v175_v32 = vperm.slane %v169_v30, 0  ;;  %v1562_v30 = vld [vmem:[%s2923_s9 + $0x60] sm:$0xf]  ;;  %v1547_v58 = vor.u32 %v1930_v50, %v1546_v49  ;;  %v1762_v49 = vld [vmem:[%s2923_s9 + $0x1e8] sm:$0xf] }
  0xd1   :  { %810 = vmatpush.bf16.msrb.mxu0 %v1739_v56  ;;  %838 = vmatpush.bf16.msrb.mxu2 %v1711_v29  ;;  %v1962_v56 = vld [vmem:[%s2923_s9 + $0x14c] sm:$0xf0]  ;;  %v1983_v50 = vld [vmem:[%s2923_s9 + $0x1f4] sm:$0xf0]  ;;  %v1602_v13 = vld [vmem:[%s2923_s9 + $0xa8] sm:$0xf] }
  0xd2   :  { %v177_v33 = vadd.f32 %v175_v32, %v173_v31  ;;  %v1934_v31 = vld [vmem:[%s2923_s9 + $0x6c] sm:$0xf0]  ;;  %v1690_v32 = vld [vmem:[%s2923_s9 + $0x160] sm:$0xf]  ;;  %826 = vmatpush.bf16.msrb.mxu1 %v1567_v44  ;;  %v1675_v59 = vor.u32 %v1962_v56, %v1674_v51  ;;  %v1644_v44 = vld [vmem:[%s2923_s9 + $0x110] sm:$0xf0]  ;;  %v1763_v56 = vor.u32 %v1983_v50, %v1762_v49 }
  0xd3   :  { %v1563_v36 = vor.u32 %v1934_v31, %v1562_v30  ;;  %v1691_v40 = vor.u32 %v1966_v37, %v1690_v32  ;;  %v1920_v37 = vld [vmem:[%s2923_s9 + $0x4] sm:$0xf]  ;;  %v1967_v49 = vld [vmem:[%s2923_s9 + $0x174] sm:$0xf0]  ;;  %v1933_v50 = vld [vmem:[%s2923_s9 + $0x6c] sm:$0xf] }
  0xd4   :  { %v178_v34 = vpack.c.bf16 %v177_v33, %v177_v33 }
  0xd5   :  { %811 = vmatpush.bf16.msrb.mxu0 %v1723_v6  ;;  %800 = vmatpush.bf16.msra.mxu3 %v1563_v36  ;;  %v1530_v6 = vld [vmem:[%s2923_s9 + $0x20] sm:$0xf] }
  0xd6   :  { %289 = vmatmul.bf16.vlgmr.msra.gmra.mxu1 %v178_v34  ;;  %302 = vmatmul.bf16.vlgmr.msra.gmra.mxu2 %v178_v34  ;;  %v1531_v15 = vor.u32 %v1926_v7, %v1530_v6 }
  0xd7   :  { %839 = vmatpush.bf16.msrb.mxu2 %v1695_v48  ;;  %827 = vmatpush.bf16.msrb.mxu1 %v1551_v4  ;;  %v1951_v48 = vld [vmem:[%s2923_s9 + $0xf4] sm:$0xf0] }
  0xd8   :  { %v1979_v4 = vld [vmem:[%s2923_s9 + $0x1d4] sm:$0xf0] }
  0xd9   :  { %812 = vmatpush.bf16.msrb.mxu0 %v1707_v19  ;;  %801 = vmatpush.bf16.msra.mxu3 %v1547_v58  ;;  %v1956_v19 = vld [vmem:[%s2923_s9 + $0x124] sm:$0xf]  ;;  %v1981_v58 = vld [vmem:[%s2923_s9 + $0x1ec] sm:$0xf] }
  0xda   :  { %v1663_v26 = vor.u32 %v1956_v19, %v1660_v20  ;;  %v1975_v19 = vld [vmem:[%s2923_s9 + $0x1b4] sm:$0xf0]  ;;  %v1941_v20 = vld [vmem:[%s2923_s9 + $0xac] sm:$0xf] }
  0xdd   :  { %813 = vmatpush.bf16.msrb.mxu0 %v1691_v40  ;;  %802 = vmatpush.bf16.msra.mxu3 %v1531_v15  ;;  %v1730_v15 = vld [vmem:[%s2923_s9 + $0x1a8] sm:$0xf] }
  0xe1   :  { %814 = vmatpush.bf16.msrb.mxu0 %v1675_v59  ;;  %v1764_v59 = vld [vmem:[%s2923_s9 + $0x1f8] sm:$0xf0] }
  0xe5   :  { %815 = vmatpush.bf16.msrb.mxu0 %v1659_v16 }
 0x153   :  { %v290_v0 = vpop.f32.mrf.mxu1 }
 0x154   :  { %v291_v5 = vadd.f32 %v290_v0, %v197_v55 }
 0x156   :  { %vm307_vm4 = vcmp.gt.f32.partialorder %v291_v5, 0.0  ;;  %v309_v11 = vmul.f32 0.01, %v291_v5 }
 0x158   :  { %v2359_v17 = vsel %vm307_vm4, %v291_v5, %v309_v11  ;;  %v1679_v5 = vor.u32 %v1960_v61, %v1676_v62  ;;  %v1618_v62 = vld [vmem:[%s2923_s9 + $0xc8] sm:$0xf] }
 0x159   :  { %v313_v23 = vrot.slane %v2359_v17, 4  ;;  %v325_v24 = vmul.f32 %v2359_v17, %v2359_v17  ;;  %v303_v25 = vpop.f32.mrf.mxu2 }
 0x15a   :  { %v304_v28 = vadd.f32 %v303_v25, %v198_v12  ;;  %840 = vmatpush.bf16.msrb.mxu2 %v1679_v5  ;;  %v1535_v25 = vor.u32 %v1924_v14, %v1532_v18  ;;  %v1945_v5 = vld [vmem:[%s2923_s9 + $0xcc] sm:$0xf]  ;;  %v1943_v14 = vld [vmem:[%s2923_s9 + $0xb4] sm:$0xf0] }
 0x15b   :  { %v314_v33 = vadd.f32 %v313_v23, %v2359_v17  ;;  %v327_v34 = vrot.slane %v325_v24, 4  ;;  %v292_v35 = vpop.f32.mrf.mxu1  ;;  %v1603_v18 = vor.u32 %v1943_v14, %v1602_v13  ;;  %v1959_v13 = vld [vmem:[%s2923_s9 + $0x134] sm:$0xf0] }
 0x15c   :  { %vm308_vm5 = vcmp.gt.f32.partialorder %v304_v28, 0.0  ;;  %v310_v39 = vmul.f32 0.01, %v304_v28  ;;  %828 = vmatpush.bf16.msrb.mxu1 %v1535_v25  ;;  %v1732_v25 = vld [vmem:[%s2923_s9 + $0x1b8] sm:$0xf0] }
 0x15d   :  { %v315_v42 = vrot.slane %v314_v33, 2  ;;  %v328_v43 = vadd.f32 %v327_v34, %v325_v24  ;;  %v1954_v34 = vld [vmem:[%s2923_s9 + $0x10c] sm:$0xf0] }
 0x15e   :  { %v2401_v47 = vsel %vm308_vm5, %v304_v28, %v310_v39  ;;  %v1922_v28 = vld [vmem:[%s2923_s9 + $0xc] sm:$0xf0]  ;;  %841 = vmatpush.bf16.msrb.mxu2 %v1663_v26  ;;  %v1952_v39 = vld [vmem:[%s2923_s9 + $0x104] sm:$0xf] }
 0x15f   :  { %v316_v52 = vadd.f32 %v315_v42, %v314_v33  ;;  %v329_v53 = vrot.slane %v328_v43, 2  ;;  %v319_v54 = vrot.slane %v2401_v47, 4  ;;  %v326_v55 = vmul.f32 %v2401_v47, %v2401_v47  ;;  %v1642_v33 = vld [vmem:[%s2923_s9 + $0x100] sm:$0xf] }
 0x160   :  { %v1515_v35 = vor.u32 %v1922_v28, %v1514_v27  ;;  %v1643_v36 = vor.u32 %v1954_v34, %v1642_v33  ;;  %v1647_v46 = vor.u32 %v1952_v39, %v1644_v44  ;;  %v1586_v27 = vld [vmem:[%s2923_s9 + $0x88] sm:$0xf]  ;;  %v1939_v28 = vld [vmem:[%s2923_s9 + $0x94] sm:$0xf0]  ;;  %v1937_v34 = vld [vmem:[%s2923_s9 + $0x8c] sm:$0xf] }
 0x161   :  { %v317_v63 = vrot.slane %v316_v52, 1  ;;  %v330_v0 = vadd.f32 %v329_v53, %v328_v43  ;;  %v320_v1 = vadd.f32 %v319_v54, %v2401_v47  ;;  %v333_v2 = vrot.slane %v326_v55, 4  ;;  %v305_v3 = vpop.f32.mrf.mxu2  ;;  %v1971_v33 = vld [vmem:[%s2923_s9 + $0x194] sm:$0xf0] }
 0x162   :  { %v1519_v43 = vor.u32 %v1920_v37, %v1516_v38  ;;  %803 = vmatpush.bf16.msra.mxu3 %v1515_v35  ;;  %816 = vmatpush.bf16.msrb.mxu0 %v1643_v36  ;;  %v1635_v54 = vor.u32 %v1951_v48, %v1634_v45  ;;  %v1746_v3 = vld [vmem:[%s2923_s9 + $0x1c8] sm:$0xf]  ;;  %v1587_v35 = vor.u32 %v1939_v28, %v1586_v27  ;;  %v1588_v36 = vld [vmem:[%s2923_s9 + $0x98] sm:$0xf0]  ;;  %v1969_v37 = vld [vmem:[%s2923_s9 + $0x18c] sm:$0xf] }
 0x163   :  { %v318_v9 = vadd.f32 %v317_v63, %v316_v52  ;;  %v331_v10 = vrot.slane %v330_v0, 1  ;;  %v321_v11 = vrot.slane %v320_v1, 2  ;;  %v334_v12 = vadd.f32 %v333_v2, %v326_v55  ;;  %v1949_v55 = vld [vmem:[%s2923_s9 + $0xec] sm:$0xf]  ;;  %842 = vmatpush.bf16.msrb.mxu2 %v1647_v46  ;;  %v1947_v63 = vld [vmem:[%s2923_s9 + $0xd4] sm:$0xf0] }
 0x164   :  { %829 = vmatpush.bf16.msrb.mxu1 %v1519_v43  ;;  %v1619_v2 = vor.u32 %v1947_v63, %v1618_v62  ;;  %v1747_v7 = vor.u32 %v1979_v4, %v1746_v3  ;;  %v1716_v38 = vld [vmem:[%s2923_s9 + $0x198] sm:$0xf0]  ;;  %v1570_v43 = vld [vmem:[%s2923_s9 + $0x68] sm:$0xf]  ;;  %v1935_v44 = vld [vmem:[%s2923_s9 + $0x74] sm:$0xf0] }
 0x165   :  { %v332_v21 = vadd.f32 %v331_v10, %v330_v0  ;;  %v2455_v22 = vmul.f32 0.125, %v318_v9  ;;  %v322_v23 = vadd.f32 %v321_v11, %v320_v1  ;;  %v335_v24 = vrot.slane %v334_v12, 2  ;;  %v1977_v9 = vld [vmem:[%s2923_s9 + $0x1cc] sm:$0xf]  ;;  %v1748_v10 = vld [vmem:[%s2923_s9 + $0x1d8] sm:$0xf0] }
 0x166   :  { %848 = vmatpush.bf16.msrb.mxu3 %v1635_v54  ;;  %861 = vmatpush.bf16.msra.mxu0 %v1763_v56  ;;  %v1639_v0 = vor.u32 %v1949_v55, %v1636_v57  ;;  %v1767_v1 = vor.u32 %v1981_v58, %v1764_v59  ;;  %v1623_v11 = vor.u32 %v1945_v5, %v1620_v8  ;;  %v1698_v48 = vld [vmem:[%s2923_s9 + $0x168] sm:$0xf]  ;;  %v1572_v56 = vld [vmem:[%s2923_s9 + $0x78] sm:$0xf0]  ;;  %v1965_v57 = vld [vmem:[%s2923_s9 + $0x16c] sm:$0xf] }
 0x167   :  { %v341_v29 = vmul.f32 0.125, %v332_v21  ;;  %v343_v30 = vmul.f32 %v2455_v22, %v2455_v22  ;;  %v323_v31 = vrot.slane %v322_v23, 1  ;;  %v336_v32 = vadd.f32 %v335_v24, %v334_v12  ;;  %v1973_v24 = vld [vmem:[%s2923_s9 + $0x1ac] sm:$0xf]  ;;  %v1700_v58 = vld [vmem:[%s2923_s9 + $0x178] sm:$0xf0] }
 0x168   :  { %874 = vmatpush.bf16.msra.mxu1 %v1639_v0  ;;  %887 = vmatpush.bf16.msra.mxu2 %v1767_v1  ;;  %v1751_v12 = vor.u32 %v1977_v9, %v1748_v10  ;;  %v1731_v21 = vor.u32 %v1975_v19, %v1730_v15  ;;  %v1571_v46 = vor.u32 %v1935_v44, %v1570_v43  ;;  %v1554_v59 = vld [vmem:[%s2923_s9 + $0x48] sm:$0xf]  ;;  %v1931_v63 = vld [vmem:[%s2923_s9 + $0x54] sm:$0xf0]  ;;  %v1929_v3 = vld [vmem:[%s2923_s9 + $0x4c] sm:$0xf] }
 0x169   :  { %v345_v40 = vsub.f32 %v341_v29, %v343_v30  ;;  %v324_v41 = vadd.f32 %v323_v31, %v322_v23  ;;  %v337_v42 = vrot.slane %v336_v32, 1  ;;  %v1604_v23 = vld [vmem:[%s2923_s9 + $0xb8] sm:$0xf0]  ;;  %v1714_v29 = vld [vmem:[%s2923_s9 + $0x188] sm:$0xf]  ;;  %v1699_v55 = vor.u32 %v1967_v49, %v1698_v48 }
 0x16a   :  { %849 = vmatpush.bf16.msrb.mxu3 %v1619_v2  ;;  %862 = vmatpush.bf16.msra.mxu0 %v1747_v7  ;;  %v1607_v31 = vor.u32 %v1941_v20, %v1604_v23  ;;  %v1703_v62 = vor.u32 %v1965_v57, %v1700_v58  ;;  %v1682_v0 = vld [vmem:[%s2923_s9 + $0x148] sm:$0xf]  ;;  %v1963_v1 = vld [vmem:[%s2923_s9 + $0x154] sm:$0xf0]  ;;  %v1555_v2 = vor.u32 %v1931_v63, %v1554_v59  ;;  %v1556_v4 = vld [vmem:[%s2923_s9 + $0x58] sm:$0xf0] }
 0x16b   :  { %v2495_v51 = vadd.f32 1e-05, %v345_v40  ;;  %v338_v52 = vadd.f32 %v337_v42, %v336_v32  ;;  %v2497_v53 = vmul.f32 0.125, %v324_v41  ;;  %v1735_v32 = vor.u32 %v1973_v24, %v1732_v25  ;;  %v1961_v5 = vld [vmem:[%s2923_s9 + $0x14c] sm:$0xf] }
 0x16c   :  { %875 = vmatpush.bf16.msra.mxu1 %v1623_v11  ;;  %888 = vmatpush.bf16.msra.mxu2 %v1751_v12  ;;  %v1715_v40 = vor.u32 %v1971_v33, %v1714_v29  ;;  %v1591_v41 = vor.u32 %v1937_v34, %v1588_v36  ;;  %v1719_v42 = vor.u32 %v1969_v37, %v1716_v38  ;;  %v1684_v9 = vld [vmem:[%s2923_s9 + $0x158] sm:$0xf0]  ;;  %v1538_v10 = vld [vmem:[%s2923_s9 + $0x28] sm:$0xf]  ;;  %v1927_v11 = vld [vmem:[%s2923_s9 + $0x34] sm:$0xf0] }
 0x16d   :  { %2021 = vrsqrt.f32 %v2495_v51  ;;  %v342_v60 = vmul.f32 0.125, %v338_v52  ;;  %v344_v61 = vmul.f32 %v2497_v53, %v2497_v53  ;;  %v1683_v8 = vor.u32 %v1963_v1, %v1682_v0  ;;  %v1666_v12 = vld [vmem:[%s2923_s9 + $0x128] sm:$0xf]  ;;  %v1925_v19 = vld [vmem:[%s2923_s9 + $0x2c] sm:$0xf] }
 0x16e   :  { %850 = vmatpush.bf16.msrb.mxu3 %v1603_v18  ;;  %863 = vmatpush.bf16.msra.mxu0 %v1731_v21  ;;  %v1559_v15 = vor.u32 %v1929_v3, %v1556_v4  ;;  %v1687_v18 = vor.u32 %v1961_v5, %v1684_v9  ;;  %v1539_v20 = vor.u32 %v1927_v11, %v1538_v10  ;;  %v1540_v21 = vld [vmem:[%s2923_s9 + $0x38] sm:$0xf0]  ;;  %v1957_v23 = vld [vmem:[%s2923_s9 + $0x12c] sm:$0xf]  ;;  %v1522_v28 = vld [vmem:[%s2923_s9 + $0x8] sm:$0xf]  ;;  %vm356_vm11 = vweird.f32 %v2495_v51 }
 0x16f   :  { %v346_v6 = vsub.f32 %v342_v60, %v344_v61  ;;  %v1575_v61 = vor.u32 %v1933_v50, %v1572_v56  ;;  %v1668_v24 = vld [vmem:[%s2923_s9 + $0x138] sm:$0xf0]  ;;  %v1667_v27 = vor.u32 %v1959_v13, %v1666_v12  ;;  %v1923_v29 = vld [vmem:[%s2923_s9 + $0x14] sm:$0xf0]  ;;  %v1543_v34 = vor.u32 %v1925_v19, %v1540_v21  ;;  %v1921_v38 = vld [vmem:[%s2923_s9 + $0xc] sm:$0xf] }
 0x170   :  { %876 = vmatpush.bf16.msra.mxu1 %v1607_v31  ;;  %889 = vmatpush.bf16.msra.mxu2 %v1735_v32  ;;  %v1955_v31 = vld [vmem:[%s2923_s9 + $0x114] sm:$0xf0]  ;;  %v347_v32 = vld [vmem:[%s2921_s7] sm:$0x3]  ;;  %v1523_v37 = vor.u32 %v1923_v29, %v1522_v28 }
 0x171   :  { %v2547_v16 = vadd.f32 1e-05, %v346_v6 }
 0x172   :  { %851 = vmatpush.bf16.msrb.mxu3 %v1587_v35  ;;  %864 = vmatpush.bf16.msra.mxu0 %v1715_v40  ;;  %v1671_v35 = vor.u32 %v1957_v23, %v1668_v24 }
 0x173   :  { %v2564_v26 = vpop.eup %2021  ;;  %2023 = vrsqrt.f32 %v2547_v16  ;;  %vm366_vm7 = vweird.f32 %v2547_v16 }
 0x174   :  { %v351_v30 = vmul.f32 %v2564_v26, %v2495_v51  ;;  %877 = vmatpush.bf16.msra.mxu1 %v1591_v41  ;;  %890 = vmatpush.bf16.msra.mxu2 %v1719_v42  ;;  %vm357_vm8 = vweird.f32 %v2564_v26  ;;  %v1524_v51 = vld [vmem:[%s2923_s9 + $0x18] sm:$0xf0]  ;;  %v1953_v41 = vld [vmem:[%s2923_s9 + $0x10c] sm:$0xf] }
 0x175   :  { %vm358_vm12 = vmor %vm356_vm11, %vm357_vm8  ;;  %v1652_v42 = vld [vmem:[%s2923_s9 + $0x118] sm:$0xf0] }
 0x176   :  { %v352_v39 = vmul.f32 %v2564_v26, %v351_v30  ;;  %852 = vmatpush.bf16.msrb.mxu3 %v1571_v46  ;;  %865 = vmatpush.bf16.msra.mxu0 %v1699_v55  ;;  %v1650_v30 = vld [vmem:[%s2923_s9 + $0x108] sm:$0xf]  ;;  %v1655_v46 = vor.u32 %v1953_v41, %v1652_v42 }
 0x177   :  { %v1651_v40 = vor.u32 %v1955_v31, %v1650_v30 }
 0x178   :  { %v353_v52 = vmul.f32 0.5, %v352_v39  ;;  %878 = vmatpush.bf16.msra.mxu1 %v1575_v61  ;;  %891 = vmatpush.bf16.msra.mxu2 %v1703_v62 }
 0x179   :  { %v2600_v45 = vpop.eup %2023 }
 0x17a   :  { %v361_v54 = vmul.f32 %v2600_v45, %v2547_v16  ;;  %v354_v6 = vsub.f32 1.5, %v353_v52  ;;  %vm367_vm6 = vweird.f32 %v2600_v45  ;;  %853 = vmatpush.bf16.msrb.mxu3 %v1555_v2  ;;  %866 = vmatpush.bf16.msra.mxu0 %v1683_v8  ;;  %v377_v52 = vld [vmem:[%s2922_s8] sm:$0x3] }
 0x17b   :  { %vm368_vm9 = vmor %vm366_vm7, %vm367_vm6 }
 0x17c   :  { %v362_v60 = vmul.f32 %v2600_v45, %v361_v54  ;;  %v355_v25 = vmul.f32 %v2564_v26, %v354_v6  ;;  %879 = vmatpush.bf16.msra.mxu1 %v1559_v15  ;;  %892 = vmatpush.bf16.msra.mxu2 %v1687_v18 }
 0x17e   :  { %v363_v7 = vmul.f32 0.5, %v362_v60  ;;  %854 = vmatpush.bf16.msrb.mxu3 %v1539_v20  ;;  %v359_v39 = vsel %vm358_vm12, %v2564_v26, %v355_v25  ;;  %867 = vmatpush.bf16.msra.mxu0 %v1667_v27 }
 0x180   :  { %v364_v14 = vsub.f32 1.5, %v363_v7  ;;  %880 = vmatpush.bf16.msra.mxu1 %v1543_v34  ;;  %893 = vmatpush.bf16.msra.mxu2 %v1671_v35 }
 0x182   :  { %v365_v16 = vmul.f32 %v2600_v45, %v364_v14  ;;  %855 = vmatpush.bf16.msrb.mxu3 %v1523_v37  ;;  %868 = vmatpush.bf16.msra.mxu0 %v1651_v40 }
 0x184   :  { %v369_v33 = vsel %vm368_vm9, %v2600_v45, %v365_v16  ;;  %v1527_v45 = vor.u32 %v1921_v38, %v1524_v51  ;;  %894 = vmatpush.bf16.msra.mxu2 %v1655_v46 }
 0x185   :  { %v372_v36 = vrot.slane %v369_v33, 7 }
 0x186   :  { %881 = vmatpush.bf16.msra.mxu1 %v1527_v45 }
 0x187   :  { %v374_v43 = vsel %vm373_vm10, %v359_v39, %v372_v36 }
 0x188   :  { %v376_v44 = vmul.f32 %v374_v43, %v347_v32 }
 0x18a   :  { %v380_v48 = vperm.slane %v376_v44, 1  ;;  %v379_v26 = vperm.slane %v376_v44, 0 }
 0x18c   :  { %v384_v49 = vmul.f32 %v380_v48, %v2497_v53  ;;  %v383_v54 = vmul.f32 %v379_v26, %v2455_v22  ;;  %v392_v57 = vmul.f32 %v380_v48, %v2401_v47  ;;  %v391_v58 = vmul.f32 %v379_v26, %v2359_v17  ;;  %v466_v47 = vld [vmem:[%s2924_s10] sm:$0xf] }
 0x18d   :  { %v469_v0 = vperm.slane %v466_v47, 1  ;;  %v468_v1 = vperm.slane %v466_v47, 0  ;;  %v471_v33 = vperm.slane %v466_v47, 3  ;;  %v470_v36 = vperm.slane %v466_v47, 2 }
 0x18e   :  { %v387_v50 = vrot.slane %v384_v49, 7 }
 0x190   :  { %v388_v55 = vsel %vm373_vm10, %v383_v54, %v387_v50 }
 0x191   :  { %v390_v56 = vsub.f32 %v377_v52, %v388_v55 }
 0x193   :  { %v394_v59 = vperm.slane %v390_v56, 0  ;;  %v395_v60 = vperm.slane %v390_v56, 1 }
 0x195   :  { %v398_v61 = vadd.f32 %v394_v59, %v391_v58  ;;  %v399_v53 = vadd.f32 %v395_v60, %v392_v57 }
 0x197   :  { %v400_v62 = vpack.c.bf16 %v398_v61, %v398_v61  ;;  %v401_v63 = vpack.c.bf16 %v399_v53, %v399_v53  ;;  %v1991_v61 = vld [vmem:[%s2927_s13 + $0x38] sm:$0xff] }
 0x198   :  { %v1999_v53 = vld [vmem:[%s2927_s13 + $0x78] sm:$0xff] }
 0x199   :  { %804 = vmatmul.bf16.vlgmr.msra.gmra.mxu3 %v400_v62  ;;  %817 = vmatmul.bf16.vlgmr.msrb.gmra.mxu0 %v401_v63 }
 0x19a   :  { %830 = vmatmul.bf16.vlgmr.msrb.gmra.mxu1 %v400_v62  ;;  %843 = vmatmul.bf16.vlgmr.msrb.gmra.mxu2 %v401_v63 }
 0x19b   :  { %1346 = vmatpush.bf16.msra.mxu3 %v1991_v61  ;;  %1359 = vmatpush.bf16.msrb.mxu0 %v1999_v53 }
 0x1a9   :  { %856 = vmatmul.bf16.vlgmr.msrb.gmra.mxu3 %v400_v62  ;;  %869 = vmatmul.bf16.vlgmr.msra.gmra.mxu0 %v401_v63 }
 0x1aa   :  { %882 = vmatmul.bf16.vlgmr.msra.gmra.mxu1 %v400_v62  ;;  %895 = vmatmul.bf16.vlgmr.msra.gmra.mxu2 %v401_v63 }
 0x216   :  { %v818_v22 = vpop.f32.mrf.mxu0 }
 0x217   :  { %v831_v17 = vpop.f32.mrf.mxu1 }
 0x218   :  { %v832_v2 = vadd.f32 %v831_v17, %v469_v0  ;;  %v2015_v17 = vld [vmem:[%s2927_s13 + $0xf8] sm:$0xff] }
 0x219   :  { %1385 = vmatpush.bf16.msrb.mxu2 %v2015_v17 }
 0x21c   :  { %v805_v3 = vpop.f32.mrf.mxu3 }
 0x21d   :  { %v806_v4 = vadd.f32 %v805_v3, %v468_v1  ;;  %v844_v5 = vpop.f32.mrf.mxu2 }
 0x21e   :  { %v845_v6 = vadd.f32 %v844_v5, %v832_v2  ;;  %v820_v7 = vpop.f32.mrf.mxu0 }
 0x21f   :  { %v819_v8 = vadd.f32 %v818_v22, %v806_v4  ;;  %v833_v9 = vpop.f32.mrf.mxu1  ;;  %v2007_v22 = vld [vmem:[%s2927_s13 + $0xb8] sm:$0xff] }
 0x220   :  { %vm901_vm13 = vcmp.gt.f32.partialorder %v845_v6, 0.0  ;;  %v905_v10 = vmul.f32 0.01, %v845_v6  ;;  %1372 = vmatpush.bf16.msrb.mxu1 %v2007_v22 }
 0x221   :  { %vm900_vm14 = vcmp.gt.f32.partialorder %v819_v8, 0.0  ;;  %v904_v11 = vmul.f32 0.01, %v819_v8 }
 0x222   :  { %v2722_v12 = vsel %vm901_vm13, %v845_v6, %v905_v10 }
 0x223   :  { %v2724_v13 = vsel %vm900_vm14, %v819_v8, %v904_v11  ;;  %v918_v14 = vrot.slane %v2722_v12, 4  ;;  %v937_v15 = vmul.f32 %v2722_v12, %v2722_v12  ;;  %v1990_v11 = vld [vmem:[%s2927_s13 + $0x30] sm:$0xff]  ;;  %vm1033_vm14 = vcmask 1042434  }
 0x224   :  { %v912_v18 = vrot.slane %v2724_v13, 4  ;;  %v936_v19 = vmul.f32 %v2724_v13, %v2724_v13  ;;  %v807_v20 = vpop.f32.mrf.mxu3  ;;  %1347 = vmatpush.bf16.msra.mxu3 %v1990_v11  ;;  %v2010_v11 = vld [vmem:[%s2927_s13 + $0xd0] sm:$0xff] }
 0x225   :  { %v919_v21 = vadd.f32 %v918_v14, %v2722_v12  ;;  %v946_v23 = vrot.slane %v937_v15, 4  ;;  %v846_v24 = vpop.f32.mrf.mxu2  ;;  %v1998_v14 = vld [vmem:[%s2927_s13 + $0x70] sm:$0xff] }
 0x226   :  { %v913_v25 = vadd.f32 %v912_v18, %v2724_v13  ;;  %v940_v16 = vrot.slane %v936_v19, 4  ;;  %v870_v27 = vpop.f32.mrf.mxu0  ;;  %1360 = vmatpush.bf16.msrb.mxu0 %v1998_v14 }
 0x227   :  { %v920_v28 = vrot.slane %v919_v21, 2  ;;  %v947_v29 = vadd.f32 %v946_v23, %v937_v15  ;;  %v883_v30 = vpop.f32.mrf.mxu1  ;;  %v2006_v15 = vld [vmem:[%s2927_s13 + $0xb0] sm:$0xff] }
 0x228   :  { %v914_v31 = vrot.slane %v913_v25, 2  ;;  %v941_v32 = vadd.f32 %v940_v16, %v936_v19  ;;  %v884_v42 = vadd.f32 %v883_v30, %v471_v33  ;;  %v2014_v23 = vld [vmem:[%s2927_s13 + $0xf0] sm:$0xff]  ;;  %1373 = vmatpush.bf16.msrb.mxu1 %v2006_v15  ;;  %v2005_v33 = vld [vmem:[%s2927_s13 + $0xa8] sm:$0xff] }
 0x229   :  { %v921_v34 = vadd.f32 %v920_v28, %v919_v21  ;;  %v948_v35 = vrot.slane %v947_v29, 2  ;;  %1386 = vmatpush.bf16.msrb.mxu2 %v2014_v23  ;;  %v1985_v15 = vld [vmem:[%s2927_s13 + $0x8] sm:$0xff] }
 0x22a   :  { %v915_v37 = vadd.f32 %v914_v31, %v913_v25  ;;  %v942_v38 = vrot.slane %v941_v32, 2  ;;  %v1989_v31 = vld [vmem:[%s2927_s13 + $0x28] sm:$0xff] }
 0x22b   :  { %v922_v51 = vrot.slane %v921_v34, 1  ;;  %v949_v39 = vadd.f32 %v948_v35, %v947_v29  ;;  %1348 = vmatpush.bf16.msra.mxu3 %v1989_v31 }
 0x22c   :  { %v916_v40 = vrot.slane %v915_v37, 1  ;;  %v943_v41 = vadd.f32 %v942_v38, %v941_v32  ;;  %v857_v43 = vpop.f32.mrf.mxu3  ;;  %v1997_v32 = vld [vmem:[%s2927_s13 + $0x68] sm:$0xff]  ;;  %1374 = vmatpush.bf16.msrb.mxu1 %v2005_v33 }
 0x22d   :  { %v923_v44 = vadd.f32 %v922_v51, %v921_v34  ;;  %v950_v45 = vrot.slane %v949_v39, 1  ;;  %v858_v46 = vadd.f32 %v857_v43, %v470_v36  ;;  %v896_v48 = vpop.f32.mrf.mxu2  ;;  %v2013_v36 = vld [vmem:[%s2927_s13 + $0xe8] sm:$0xff]  ;;  %1361 = vmatpush.bf16.msrb.mxu0 %v1997_v32  ;;  %v1996_v43 = vld [vmem:[%s2927_s13 + $0x60] sm:$0xff] }
 0x22e   :  { %v917_v26 = vadd.f32 %v916_v40, %v915_v37  ;;  %v944_v49 = vrot.slane %v943_v41, 1  ;;  %v897_v50 = vadd.f32 %v896_v48, %v884_v42  ;;  %v872_v52 = vpop.f32.mrf.mxu0  ;;  %1387 = vmatpush.bf16.msrb.mxu2 %v2013_v36  ;;  %v1988_v42 = vld [vmem:[%s2927_s13 + $0x20] sm:$0xff] }
 0x22f   :  { %v951_v54 = vadd.f32 %v950_v45, %v949_v39  ;;  %v2734_v55 = vmul.f32 0.125, %v923_v44  ;;  %v871_v56 = vadd.f32 %v870_v27, %v858_v46  ;;  %v885_v57 = vpop.f32.mrf.mxu1  ;;  %v2004_v44 = vld [vmem:[%s2927_s13 + $0xa0] sm:$0xff]  ;;  %1349 = vmatpush.bf16.msra.mxu3 %v1988_v42 }
 0x230   :  { %v945_v58 = vadd.f32 %v944_v49, %v943_v41  ;;  %v2736_v59 = vmul.f32 0.125, %v917_v26  ;;  %vm903_vm15 = vcmp.gt.f32.partialorder %v897_v50, 0.0  ;;  %v907_v60 = vmul.f32 0.01, %v897_v50  ;;  %v2012_v48 = vld [vmem:[%s2927_s13 + $0xe0] sm:$0xff]  ;;  %1375 = vmatpush.bf16.msrb.mxu1 %v2004_v44 }
 0x231   :  { %v969_v62 = vmul.f32 0.125, %v951_v54  ;;  %v973_v63 = vmul.f32 %v2734_v55, %v2734_v55  ;;  %vm902_vm0 = vcmp.gt.f32.partialorder %v871_v56, 0.0  ;;  %v906_v47 = vmul.f32 0.01, %v871_v56  ;;  %1362 = vmatpush.bf16.msrb.mxu0 %v1996_v43 }
 0x232   :  { %v968_v0 = vmul.f32 0.125, %v945_v58  ;;  %v972_v1 = vmul.f32 %v2736_v59, %v2736_v59  ;;  %v2754_v2 = vsel %vm903_vm15, %v897_v50, %v907_v60  ;;  %1388 = vmatpush.bf16.msrb.mxu2 %v2012_v48  ;;  %v1987_v58 = vld [vmem:[%s2927_s13 + $0x18] sm:$0xff]  ;;  %vm1035_vm15 = vcmask 1041408  }
 0x233   :  { %v977_v3 = vsub.f32 %v969_v62, %v973_v63  ;;  %v2756_v4 = vsel %vm902_vm0, %v871_v56, %v906_v47  ;;  %v930_v5 = vrot.slane %v2754_v2, 4  ;;  %v939_v6 = vmul.f32 %v2754_v2, %v2754_v2  ;;  %v1995_v60 = vld [vmem:[%s2927_s13 + $0x58] sm:$0xff]  ;;  %1350 = vmatpush.bf16.msra.mxu3 %v1987_v58 }
 0x234   :  { %v976_v7 = vsub.f32 %v968_v0, %v972_v1  ;;  %v924_v8 = vrot.slane %v2756_v4, 4  ;;  %v938_v9 = vmul.f32 %v2756_v4, %v2756_v4  ;;  %v859_v10 = vpop.f32.mrf.mxu3  ;;  %v2003_v63 = vld [vmem:[%s2927_s13 + $0x98] sm:$0xff] }
 0x235   :  { %v2773_v18 = vadd.f32 1e-05, %v977_v3  ;;  %v931_v19 = vadd.f32 %v930_v5, %v2754_v2  ;;  %v958_v20 = vrot.slane %v939_v6, 4  ;;  %v898_v21 = vpop.f32.mrf.mxu2  ;;  %v2011_v47 = vld [vmem:[%s2927_s13 + $0xd8] sm:$0xff]  ;;  %1363 = vmatpush.bf16.msrb.mxu0 %v1995_v60  ;;  %1376 = vmatpush.bf16.msrb.mxu1 %v2003_v63  ;;  %v1986_v5 = vld [vmem:[%s2927_s13 + $0x10] sm:$0xff] }
 0x236   :  { %v925_v24 = vadd.f32 %v924_v8, %v2756_v4  ;;  %v952_v25 = vrot.slane %v938_v9, 4  ;;  %v2780_v28 = vadd.f32 1e-05, %v976_v7  ;;  %1389 = vmatpush.bf16.msrb.mxu2 %v2011_v47  ;;  %v2002_v7 = vld [vmem:[%s2927_s13 + $0x90] sm:$0xff]  ;;  %v2009_v21 = vld [vmem:[%s2927_s13 + $0xc8] sm:$0xff] }
 0x237   :  { %v932_v16 = vrot.slane %v931_v19, 2  ;;  %v959_v27 = vadd.f32 %v958_v20, %v939_v6  ;;  %2025 = vrsqrt.f32 %v2773_v18  ;;  %v1994_v6 = vld [vmem:[%s2927_s13 + $0x50] sm:$0xff]  ;;  %1351 = vmatpush.bf16.msra.mxu3 %v1986_v5  ;;  %v2001_v20 = vld [vmem:[%s2927_s13 + $0x88] sm:$0xff]  ;;  %vm1001_vm3 = vweird.f32 %v2773_v18 }
 0x238   :  { %v926_v29 = vrot.slane %v925_v24, 2  ;;  %v953_v30 = vadd.f32 %v952_v25, %v938_v9  ;;  %2027 = vrsqrt.f32 %v2780_v28  ;;  %v1984_v25 = vld [vmem:[%s2927_s13] sm:$0xff]  ;;  %vm991_vm4 = vweird.f32 %v2780_v28 }
 0x239   :  { %v933_v34 = vadd.f32 %v932_v16, %v931_v19  ;;  %v960_v35 = vrot.slane %v959_v27, 2  ;;  %1364 = vmatpush.bf16.msrb.mxu0 %v1994_v6  ;;  %v1993_v19 = vld [vmem:[%s2927_s13 + $0x48] sm:$0xff]  ;;  %1377 = vmatpush.bf16.msrb.mxu1 %v2002_v7  ;;  %v1992_v16 = vld [vmem:[%s2927_s13 + $0x40] sm:$0xff] }
 0x23a   :  { %v927_v37 = vadd.f32 %v926_v29, %v925_v24  ;;  %v954_v38 = vrot.slane %v953_v30, 2  ;;  %1390 = vmatpush.bf16.msrb.mxu2 %v2010_v11  ;;  %v2008_v29 = vld [vmem:[%s2927_s13 + $0xc0] sm:$0xff] }
 0x23b   :  { %v934_v51 = vrot.slane %v933_v34, 1  ;;  %v961_v39 = vadd.f32 %v960_v35, %v959_v27  ;;  %1352 = vmatpush.bf16.msra.mxu3 %v1985_v15  ;;  %v2000_v27 = vld [vmem:[%s2927_s13 + $0x80] sm:$0xff] }
 0x23c   :  { %v928_v40 = vrot.slane %v927_v37, 1  ;;  %v955_v41 = vadd.f32 %v954_v38, %v953_v30 }
 0x23d   :  { %v935_v45 = vadd.f32 %v934_v51, %v933_v34  ;;  %v962_v46 = vrot.slane %v961_v39, 1  ;;  %v2808_v26 = vpop.eup %2025  ;;  %1365 = vmatpush.bf16.msrb.mxu0 %v1993_v19  ;;  %1378 = vmatpush.bf16.msrb.mxu1 %v2001_v20 }
 0x23e   :  { %v929_v49 = vadd.f32 %v928_v40, %v927_v37  ;;  %v956_v50 = vrot.slane %v955_v41, 1  ;;  %v996_v61 = vmul.f32 %v2808_v26, %v2773_v18  ;;  %v2830_v22 = vpop.eup %2027  ;;  %1391 = vmatpush.bf16.msrb.mxu2 %v2009_v21  ;;  %vm1002_vm1 = vweird.f32 %v2808_v26 }
 0x23f   :  { %v963_v52 = vadd.f32 %v962_v46, %v961_v39  ;;  %v2810_v54 = vmul.f32 0.125, %v935_v45  ;;  %v986_v8 = vmul.f32 %v2830_v22, %v2780_v28  ;;  %1353 = vmatpush.bf16.msra.mxu3 %v1984_v25  ;;  %vm992_vm2 = vweird.f32 %v2830_v22  ;;  %vm1003_vm5 = vmor %vm1001_vm3, %vm1002_vm1 }
 0x240   :  { %v957_v56 = vadd.f32 %v956_v50, %v955_v41  ;;  %v2812_v57 = vmul.f32 0.125, %v929_v49  ;;  %v997_v9 = vmul.f32 %v2808_v26, %v996_v61  ;;  %vm2881_vm8 = vmor %vm991_vm4, %vm992_vm2 }
 0x241   :  { %v971_v53 = vmul.f32 0.125, %v963_v52  ;;  %v975_v62 = vmul.f32 %v2810_v54, %v2810_v54  ;;  %v987_v23 = vmul.f32 %v2830_v22, %v986_v8  ;;  %1366 = vmatpush.bf16.msrb.mxu0 %v1992_v16  ;;  %1379 = vmatpush.bf16.msrb.mxu1 %v2000_v27 }
 0x242   :  { %v970_v17 = vmul.f32 0.125, %v957_v56  ;;  %v974_v0 = vmul.f32 %v2812_v57, %v2812_v57  ;;  %v998_v24 = vmul.f32 0.5, %v997_v9  ;;  %1392 = vmatpush.bf16.msrb.mxu2 %v2008_v29  ;;  %v980_v56 = vld [vmem:[%s2925_s11] sm:$0xf] }
 0x243   :  { %v979_v1 = vsub.f32 %v971_v53, %v975_v62  ;;  %v988_v31 = vmul.f32 0.5, %v987_v23  ;;  %v1039_v9 = vld [vmem:[%s2926_s12] sm:$0xf] }
 0x244   :  { %v978_v3 = vsub.f32 %v970_v17, %v974_v0  ;;  %v999_v32 = vsub.f32 1.5, %v998_v24 }
 0x245   :  { %v984_v10 = vadd.f32 1e-05, %v979_v1  ;;  %v989_v37 = vsub.f32 1.5, %v988_v31 }
 0x246   :  { %v983_v14 = vadd.f32 1e-05, %v978_v3  ;;  %v1000_v38 = vmul.f32 %v2808_v26, %v999_v32 }
 0x247   :  { %2029 = vrsqrt.f32 %v984_v10  ;;  %v990_v44 = vmul.f32 %v2830_v22, %v989_v37  ;;  %vm1021_vm9 = vweird.f32 %v984_v10 }
 0x248   :  { %2031 = vrsqrt.f32 %v983_v14  ;;  %v1004_v42 = vsel %vm1003_vm5, %v2808_v26, %v1000_v38  ;;  %vm1011_vm11 = vweird.f32 %v983_v14 }
 0x249   :  { %v1029_v18 = vrot.slane %v1004_v42, 7  ;;  %v994_v26 = vsel %vm2881_vm8, %v2830_v22, %v990_v44 }
 0x24b   :  { %v1032_v58 = vsel %vm373_vm10, %v994_v26, %v1029_v18 }
 0x24d   :  { %v2030_v30 = vpop.eup %2029 }
 0x24e   :  { %v2032_v33 = vpop.eup %2031  ;;  %v1016_v34 = vmul.f32 %v2030_v30, %v984_v10  ;;  %vm1022_vm6 = vweird.f32 %v2030_v30 }
 0x24f   :  { %v1006_v35 = vmul.f32 %v2032_v33, %v983_v14  ;;  %vm1012_vm7 = vweird.f32 %v2032_v33  ;;  %vm1023_vm12 = vmor %vm1021_vm9, %vm1022_vm6 }
 0x250   :  { %v1017_v36 = vmul.f32 %v2030_v30, %v1016_v34  ;;  %vm1013_vm13 = vmor %vm1011_vm11, %vm1012_vm7 }
 0x251   :  { %v1007_v51 = vmul.f32 %v2032_v33, %v1006_v35 }
 0x252   :  { %v1018_v39 = vmul.f32 0.5, %v1017_v36 }
 0x253   :  { %v1008_v40 = vmul.f32 0.5, %v1007_v51 }
 0x254   :  { %v1019_v41 = vsub.f32 1.5, %v1018_v39 }
 0x255   :  { %v1009_v43 = vsub.f32 1.5, %v1008_v40 }
 0x256   :  { %v1020_v46 = vmul.f32 %v2030_v30, %v1019_v41 }
 0x257   :  { %v1010_v48 = vmul.f32 %v2032_v33, %v1009_v43 }
 0x258   :  { %v1024_v28 = vsel %vm1023_vm12, %v2030_v30, %v1020_v46 }
 0x259   :  { %v1014_v49 = vsel %vm1013_vm13, %v2032_v33, %v1010_v48  ;;  %v1031_v52 = vrot.slane %v1024_v28, 5 }
 0x25a   :  { %v1030_v50 = vrot.slane %v1014_v49, 6 }
 0x25c   :  { %v1034_v60 = vsel %vm1033_vm14, %v1030_v50, %v1031_v52 }
 0x25d   :  { %v1036_v61 = vsel %vm1035_vm15, %v1032_v58, %v1034_v60 }
 0x25e   :  { %v1038_v53 = vmul.f32 %v1036_v61, %v980_v56 }
 0x260   :  { %v1043_v62 = vperm.slane %v1038_v53, 2  ;;  %v1044_v63 = vperm.slane %v1038_v53, 3  ;;  %v1042_v47 = vperm.slane %v1038_v53, 1  ;;  %v1041_v22 = vperm.slane %v1038_v53, 0 }
 0x262   :  { %v1051_v17 = vmul.f32 %v1043_v62, %v2812_v57  ;;  %v1052_v0 = vmul.f32 %v1044_v63, %v2810_v54  ;;  %v1050_v1 = vmul.f32 %v1042_v47, %v2734_v55  ;;  %v1049_v6 = vmul.f32 %v1041_v22, %v2736_v59 }
 0x263   :  { %v1068_v54 = vmul.f32 %v1044_v63, %v2754_v2  ;;  %v1065_v55 = vmul.f32 %v1041_v22, %v2724_v13  ;;  %v1066_v14 = vmul.f32 %v1042_v47, %v2722_v12  ;;  %v1067_v59 = vmul.f32 %v1043_v62, %v2756_v4  ;;  %v2018_v2 = vld [vmem:[%s2928_s14] ss:$0 sm:$0xff] }
 0x264   :  { %v1058_v3 = vrot.slane %v1051_v17, 6  ;;  %v1059_v5 = vrot.slane %v1052_v0, 5  ;;  %v1057_v7 = vrot.slane %v1050_v1, 7 }
 0x266   :  { %v1061_v8 = vsel %vm1033_vm14, %v1058_v3, %v1059_v5  ;;  %v1060_v10 = vsel %vm373_vm10, %v1049_v6, %v1057_v7 }
 0x267   :  { %v1062_v11 = vsel %vm1035_vm15, %v1060_v10, %v1061_v8 }
 0x268   :  { %v1064_v57 = vsub.f32 %v1039_v9, %v1062_v11 }
 0x26a   :  { %v1070_v15 = vperm.slane %v1064_v57, 0  ;;  %v1071_v19 = vperm.slane %v1064_v57, 1  ;;  %v1072_v20 = vperm.slane %v1064_v57, 2  ;;  %v1073_v21 = vperm.slane %v1064_v57, 3 }
 0x26c   :  { %v1078_v23 = vadd.f32 %v1070_v15, %v1065_v55  ;;  %v1079_v24 = vadd.f32 %v1071_v19, %v1066_v14  ;;  %v1080_v25 = vadd.f32 %v1072_v20, %v1067_v59  ;;  %v1081_v16 = vadd.f32 %v1073_v21, %v1068_v54 }
 0x26e   :  { %v1082_v27 = vpack.c.bf16 %v1078_v23, %v1078_v23  ;;  %v1083_v29 = vpack.c.bf16 %v1079_v24, %v1079_v24  ;;  %v1084_v30 = vpack.c.bf16 %v1080_v25, %v1080_v25  ;;  %v1085_v31 = vpack.c.bf16 %v1081_v16, %v1081_v16 }
 0x270   :  { %1354 = vmatmul.bf16.vlgmr.msra.gmra.mxu3 %v1082_v27  ;;  %1367 = vmatmul.bf16.vlgmr.msrb.gmra.mxu0 %v1083_v29 }
 0x271   :  { %1380 = vmatmul.bf16.vlgmr.msrb.gmra.mxu1 %v1084_v30  ;;  %1393 = vmatmul.bf16.vlgmr.msrb.gmra.mxu2 %v1085_v31 }
 0x2ed   :  { %v1368_v13 = vpop.f32.mrf.mxu0 }
 0x2ee   :  { %v1381_v12 = vpop.f32.mrf.mxu1 }
 0x2f3   :  { %v1355_v4 = vpop.f32.mrf.mxu3 }
 0x2f4   :  { %v1356_v32 = vadd.f32 %v2018_v2, %v1355_v4  ;;  %v1394_v33 = vpop.f32.mrf.mxu2 }
 0x2f5   :  { %v1370_v34 = vpop.f32.mrf.mxu0 }
 0x2f6   :  { %v1369_v35 = vadd.f32 %v1368_v13, %v1356_v32  ;;  %v1383_v36 = vpop.f32.mrf.mxu1 }
 0x2f8   :  { %v1382_v37 = vadd.f32 %v1381_v12, %v1369_v35 }
 0x2fa   :  { %v1395_v38 = vadd.f32 %v1394_v33, %v1382_v37 }
 0x2fb   :  { %v1357_v51 = vpop.f32.mrf.mxu3 }
 0x2fc   :  { %v1398_v39 = vmax.f32 %v1395_v38, 0.0  ;;  %v1396_v40 = vpop.f32.mrf.mxu2 }
 0x2fe   :  { %1399 = vst [vmem:[#allocation2] sm:$0xff] %v1398_v39 }
 0x2ff   :  { %1410 = dma.vmem_to_hbm [thread:$0]  %s1406_s28, 128, %s1408_s30, [#allocation3]  }
 0x300   :  { %2057 = dma.done.wait [#allocation3], 128  }
 0x301   :  { %2058 = vsyncadd [#allocation3], 4294967168 }
 0x302   :  { %1415 = vsyncpa [#allocation3], 1 }

</bundles_post_ra>
